<compile_context>
chip_gen: v7x
topology: tpu7x:2x2x1
jax: 0.10.0
libtpu: 0.0.40
codegen_flags: <defaults>
</compile_context>

<pallas_src>
from functools import partial

import jax
import jax.numpy as jnp
from jax.experimental import pallas as pl
from jax.experimental.pallas import tpu as pltpu


def _relux_kernel(x_ref, o_ref, *, thre):
    x = x_ref[...]
    lo = jnp.zeros((), dtype=x.dtype)
    hi = jnp.asarray(thre, dtype=x.dtype)  # note: truncates fractional thre for int dtypes
    o_ref[...] = jnp.minimum(jnp.maximum(x, lo), hi)


def _vmem_capacity_bytes() -> int:
    try:
        return int(pltpu.get_tpu_info().vmem_capacity_bytes)
    except Exception:
        return 64 * 1024 * 1024  # conservative fallback (v7x per-TC VMEM)


def _pick_block_bytes() -> int:
    vmem = _vmem_capacity_bytes()
    # Total in-flight VMEM = in + out, double buffered = 4 buffers; keep that
    # around a third of capacity: ~8 MiB blocks on 128 MiB chips (v5e/v6e),
    # ~5 MiB on v7x's 64 MiB-per-TensorCore VMEM.
    blk = (vmem // 3) // 4
    blk = max(1 << 20, min(8 << 20, blk))
    return (blk >> 20) << 20  # round down to whole MiB


def _relux_2d(x2d: jax.Array, thre, tr: int, vmem_limit_bytes: int) -> jax.Array:
    rows, cols = x2d.shape
    grid = (pl.cdiv(rows, tr),)
    return pl.pallas_call(
        partial(_relux_kernel, thre=thre),
        out_shape=jax.ShapeDtypeStruct((rows, cols), x2d.dtype),
        grid=grid,
        in_specs=[pl.BlockSpec((tr, cols), lambda i: (i, 0))],
        out_specs=pl.BlockSpec((tr, cols), lambda i: (i, 0)),
        input_output_aliases={0: 0},
        compiler_params=pltpu.CompilerParams(
            dimension_semantics=("parallel",),  # shards row blocks across v7x's 2 TCs
            vmem_limit_bytes=vmem_limit_bytes,
        ),
    )(x2d)


def relux(x: jax.Array, thre: float = 4.0, *, block_bytes: int | None = None) -> jax.Array:
    """clamp(x, 0, thre), matching torch.clamp semantics, any input shape."""
    orig_shape = x.shape
    dtype = x.dtype
    itemsize = jnp.dtype(dtype).itemsize
    total = x.size
    if total == 0:
        return x
    if block_bytes is None:
        block_bytes = _pick_block_bytes()

    # Per-dtype sublane multiple: 8 (4-byte) / 16 (2-byte) / 32 (1-byte).
    sub = max(8, 32 // max(itemsize, 1))

    x_flat = jnp.reshape(x, (total,))

    # Split into a lane-aligned main part (multiple of 128) streamed through
    # the kernel and a tiny (<128-element) tail handled outside it.  This
    # replaces the old full-array pad + slice HBM round trips.
    tail = total % 128
    main = total - tail

    if main == 0:
        # Fewer than 128 elements: single full block (block shape == array shape).
        out2d = _relux_2d(x_flat.reshape(1, total), thre, 1, 16 << 20)
        return out2d.reshape(orig_shape)

    x_main = x_flat[:main] if tail else x_flat

    # Widest lane-dense last dim that divides the main part exactly.
    C = 128
    for cand in (8192, 4096, 2048, 1024, 512, 256, 128):
        if main % cand == 0:
            C = cand
            break
    rows = main // C
    x2d = x_main.reshape(rows, C)

    # Row tile targeting ~block_bytes per input block, aligned to `sub`, and
    # capped so the grid has >= ~4 blocks whenever possible (keeps both v7x
    # TensorCores streaming HBM).  The cdiv grid masks the partial last block,
    # so `rows` need not be a multiple of `sub` or `tr`.
    tr = max(sub, (block_bytes // (C * itemsize) // sub) * sub)
    cap = max(sub, (((rows + 3) // 4) // sub) * sub)
    tr = min(tr, cap, rows)

    blk_bytes_actual = tr * C * itemsize
    vmem_limit = min(
        _vmem_capacity_bytes(),
        max(16 << 20, 4 * blk_bytes_actual + (4 << 20)),
    )

    out_main = _relux_2d(x2d, thre, tr, vmem_limit).reshape(main)

    if tail:
        lo = jnp.zeros((), dtype=dtype)
        hi = jnp.asarray(thre, dtype=dtype)
        out_tail = jnp.minimum(jnp.maximum(x_flat[main:], lo), hi)
        out_flat = jnp.concatenate([out_main, out_tail])
    else:
        out_flat = out_main
    return out_flat.reshape(orig_shape)


if __name__ == "__main__":
    thre = 4.0

    # Small NCHW feature map (clean path: no tail, no partial blocks).
    x = jax.random.normal(jax.random.PRNGKey(0), (2, 4, 16, 16), dtype=jnp.float32) * 5.0
    out = jax.block_until_ready(relux(x, thre=thre))
    ref = jnp.clip(x, 0.0, thre)
    assert out.shape == x.shape
    assert out.dtype == x.dtype
    assert bool(jnp.array_equal(out, ref))

    # Awkward size: exercises the main-kernel + (<128-element) tail path and a
    # masked partial last row block.
    y = jax.random.normal(jax.random.PRNGKey(1), (3, 5, 7, 11), dtype=jnp.float32) * 5.0
    out_y = jax.block_until_ready(relux(y, thre=thre))
    ref_y = jnp.clip(y, 0.0, thre)
    assert out_y.shape == y.shape
    assert bool(jnp.array_equal(out_y, ref_y))

    # Tiny (<128 elements) path.
    z = jax.random.normal(jax.random.PRNGKey(2), (5, 7), dtype=jnp.float32) * 5.0
    out_z = jax.block_until_ready(relux(z, thre=thre))
    assert bool(jnp.array_equal(out_z, jnp.clip(z, 0.0, thre)))

    # bf16 path (sublane multiple 16, no f32 promotion inside the kernel).
    w = (jax.random.normal(jax.random.PRNGKey(3), (4, 8, 32), dtype=jnp.float32) * 5.0).astype(jnp.bfloat16)
    out_w = jax.block_until_ready(relux(w, thre=thre))
    ref_w = jnp.clip(w.astype(jnp.float32), 0.0, thre).astype(jnp.bfloat16)
    assert out_w.dtype == jnp.bfloat16
    assert bool(jnp.array_equal(out_w, ref_w))

    print("KERNEL_OK")
</pallas_src>

<mosaic_0001>
module attributes {stable_mosaic.version = 11 : i64} {
  func.func @_relux_kernel(%arg0: i32, %arg1: memref<1x2048xf32, #tpu.memory_space<vmem>>, %arg2: memref<1x2048xf32, #tpu.memory_space<vmem>>) attributes {dimension_semantics = [#tpu.dimension_semantics<parallel>], iteration_bounds = array<i64: 1>, scalar_prefetch = 0 : i64, scratch_operands = 0 : i64, tpu.core_type = #tpu.core_type<tc>, window_params = [{transform_indices = @transform_0, window_bounds = array<i64: 1, 2048>}, {transform_indices = @transform_1, window_bounds = array<i64: 1, 2048>}]} {
    %c0 = arith.constant 0 : index
    %c0_0 = arith.constant 0 : index
    %0 = vector.load %arg1[%c0, %c0_0] : memref<1x2048xf32, #tpu.memory_space<vmem>>, vector<1x2048xf32>
    %cst = arith.constant 0.000000e+00 : f32
    %1 = vector.broadcast %cst : f32 to vector<1x2048xf32>
    %2 = arith.maximumf %0, %1 : vector<1x2048xf32>
    %cst_1 = arith.constant 4.000000e+00 : f32
    %3 = vector.broadcast %cst_1 : f32 to vector<1x2048xf32>
    %4 = arith.minimumf %2, %3 : vector<1x2048xf32>
    %c0_2 = arith.constant 0 : index
    %c0_3 = arith.constant 0 : index
    %5 = vector.load %arg2[%c0_2, %c0_3] : memref<1x2048xf32, #tpu.memory_space<vmem>>, vector<1x2048xf32>
    tpu.vector_store %arg2[%c0_2, %c0_3], %4 {strides = array<i32>} : memref<1x2048xf32, #tpu.memory_space<vmem>>, vector<1x2048xf32>,
    return
  }
  func.func @transform_0(%arg0: i32) -> (i32, i32) {
    %c0_i32 = arith.constant 0 : i32
    %c0_i32_0 = arith.constant 0 : i32
    return %arg0, %c0_i32 : i32, i32
  }
  func.func @transform_1(%arg0: i32) -> (i32, i32) {
    %c0_i32 = arith.constant 0 : i32
    %c0_i32_0 = arith.constant 0 : i32
    return %arg0, %c0_i32 : i32, i32
  }
}

</mosaic_0001>

<bundles_post_ra>
// kernel: tpu_custom_call.1
= control target key start
LH: loop header
LB: loop body
LE: loop exit
PB: predicated region body
PF: predicated region fallthrough
CT: control target
= control target key end

     0   :  { %6 = vsyncpa [#allocation3], 0  ;;  %s130_s0 = inlined_call_operand.hbm [shape: f32[1,2048], index: 0, kind: input, shape index: {}, may-alias: {0,1}]   ;;  %s131_s1 = inlined_call_operand.hbm [shape: f32[1,2048], index: 1, kind: output, shape index: {}, may-alias: {0,1}]  }
   0x1   :  { %7 = vsyncpa [#allocation4], 0  ;;  %s94_s6 = smov [#allocation2]   ;;  %s46_s10 = scalar_lea.hbm %s130_s0, 256 }
   0x2   :  { %s14_s7 = sshll.u32 %s94_s6, 4  ;;  %p47_p0 = scmp.ne.s32.totalorder %s130_s0, %s46_s10  ;;  %s15_s7 = int_to_ptr.vmem [resolvable:$true] %s14_s7 }
   0x3   :  { %p50_p1 = scmp.lt.u32.totalorder %s46_s10, %s130_s0 }
   0x5   :  { %p52_p2 = pnand %p50_p1, %p47_p0 }
   0x7   :  { %55 = shalt.err (!%p52_p2)
}
   0x8   :  { %s56_s15 = scalar_lea.vmem %s15_s7, 256  ;;  %p61_p4 = scmp.lt.s32.totalorder %s15_s7, %s15_s7 }
   0x9   :  { %p57_p3 = scmp.ne.s32.totalorder %s15_s7, %s56_s15  ;;  %p62_p5 = scmp.lt.s32.totalorder %s56_s15, %s56_s15 }
   0xb   :  { %p63_p6 = por %p62_p5, %p61_p4 }
   0xd   :  { %p64_p7 = pnand %p63_p6, %p57_p3 }
   0xf   :  { %67 = shalt.err (!%p64_p7)
}
  0x10   :  { %17 = dma.hbm_to_vmem [thread:$0]  %s130_s0, 256, %s15_s7, [#allocation3]  }
  0x11   :  { %90 = dma.done.wait [#allocation3], 256  }
  0x12   :  { %91 = vsyncadd [#allocation3], 4294967040  ;;  %v21_v0 = vld [vmem:[#allocation2] sm:$0xff]  ;;  %v22_v1 = vld [vmem:[#allocation2 + $0x8] sm:$0xff]  ;;  %s95_s18 = smov [#allocation5]  }
  0x13   :  { %s35_s19 = sshll.u32 %s95_s18, 4  ;;  %v23_v2 = vmax.f32 %v21_v0, 0.0  ;;  %v24_v3 = vmax.f32 %v22_v1, 0.0  ;;  %s36_s19 = int_to_ptr.vmem [resolvable:$true] %s35_s19 }
  0x14   :  { %s68_s20 = scalar_lea.vmem %s36_s19, 256  ;;  %p73_p9 = scmp.lt.s32.totalorder %s36_s19, %s36_s19 }
  0x15   :  { %v25_v4 = vmin.f32 %v23_v2, 4.0  ;;  %v26_v5 = vmin.f32 %v24_v3, 4.0  ;;  %p69_p8 = scmp.ne.s32.totalorder %s36_s19, %s68_s20  ;;  %p74_p10 = scmp.lt.s32.totalorder %s68_s20, %s68_s20 }
  0x17   :  { %27 = vst [vmem:[#allocation5] sm:$0xff] %v25_v4  ;;  %28 = vst [vmem:[#allocation5 + $0x8] sm:$0xff] %v26_v5  ;;  %p75_p11 = por %p74_p10, %p73_p9 }
  0x19   :  { %p76_p12 = pnand %p75_p11, %p69_p8 }
  0x1b   :  { %79 = shalt.err (!%p76_p12)
}
  0x1c   :  { %s80_s22 = scalar_lea.hbm %s131_s1, 256 }
  0x1d   :  { %p81_p13 = scmp.ne.s32.totalorder %s131_s1, %s80_s22  ;;  %p84_p0 = scmp.lt.u32.totalorder %s80_s22, %s131_s1 }
  0x1f   :  { %p86_p1 = pnand %p84_p0, %p81_p13 }
  0x21   :  { %89 = shalt.err (!%p86_p1)
}
  0x22   :  { %38 = dma.vmem_to_hbm [thread:$0]  %s36_s19, 256, %s131_s1, [#allocation4]  }
  0x23   :  { %92 = dma.done.wait [#allocation4], 256  }
  0x24   :  { %93 = vsyncadd [#allocation4], 4294967040 }
  0x25   :  { %42 = vsyncpa [#allocation3], 1 }
  0x26   :  { %43 = vsyncpa [#allocation4], 1 }

</bundles_post_ra>
